<compile_context>
chip_gen: v6e
topology: v6e:2x2x1
jax: 0.10.0
libtpu: 0.0.40
codegen_flags: <defaults>
</compile_context>

<pallas_src>
import jax
import jax.numpy as jnp
from jax import lax
from jax.experimental import pallas as pl
from jax.experimental.pallas import tpu as pltpu


def _round_up(x: int, m: int) -> int:
    return ((x + m - 1) // m) * m


def _conv3d_tanh_kernel(pt_ref, w_ref, b_ref, o_ref):
    # pt_ref: (K, TM) patch columns, w_ref: (OC, K), b_ref: (OC, 1), o_ref: (OC, TM)
    acc = jnp.dot(w_ref[...], pt_ref[...], preferred_element_type=jnp.float32)
    acc = acc + b_ref[...]                       # broadcast bias along lanes
    o_ref[...] = jnp.tanh(acc).astype(o_ref.dtype)


def conv3d_tanh(x, weight, bias, *, tm: int = 2048, compute_dtype=None):
    """Conv3d(k=2, s=2, p=0) + bias + tanh.

    x: (N, C, D, H, W); weight: (OC, C, 2, 2, 2); bias: (OC,).
    Returns (N, OC, D//2, H//2, W//2), matching the PyTorch module.
    """
    N, C, D, H, W = x.shape
    OC = weight.shape[0]
    Do, Ho, Wo = D // 2, H // 2, W // 2
    K = C * 8
    M = Do * Ho * Wo
    out_dtype = x.dtype

    # PyTorch floor behaviour for odd spatial dims (free slice when already even).
    x = x[:, :, : 2 * Do, : 2 * Ho, : 2 * Wo]

    # ---- glue: build the transposed patch tensor (N, K, M) ----
    # k order (c, kd, kh, kw) matches PyTorch's OIDHW weight flatten;
    # m order (do, ho, wo) makes the NCDHW output a pure reshape afterwards.
    # TODO(synk): this single XLA transpose is the one remaining input-sized HBM
    # round trip; removing it needs in-kernel lane-strided gathers or manual
    # pl.ANY tap DMAs, skipped here for lowering robustness.
    x8 = x.reshape(N, C, Do, 2, Ho, 2, Wo, 2)
    pt = jnp.transpose(x8, (0, 1, 3, 5, 7, 2, 4, 6)).reshape(N, K, M)

    w_mat = weight.reshape(OC, K)                       # same (c, kd, kh, kw) order
    b_mat = bias.reshape(OC, 1).astype(jnp.float32)

    if compute_dtype is not None:
        pt = pt.astype(compute_dtype)
        w_mat = w_mat.astype(compute_dtype)

    # ---- choose the M tile: multiple of 128 lanes, as large as useful ----
    tm = max(128, _round_up(int(tm), 128))
    tm_eff = min(tm, _round_up(M, 128))
    # Keep >=2 grid steps so both v7x TensorCores get work.
    if N * (_round_up(M, tm_eff) // tm_eff) < 2 and M > 128:
        tm_eff = _round_up((M + 1) // 2, 128)
    Mp = _round_up(M, tm_eff)
    if Mp != M:
        pt = jnp.pad(pt, ((0, 0), (0, 0), (0, Mp - M)))
    grid = (N, Mp // tm_eff)

    out_flat = pl.pallas_call(
        _conv3d_tanh_kernel,
        out_shape=jax.ShapeDtypeStruct((N, OC, Mp), out_dtype),
        grid_spec=pltpu.PrefetchScalarGridSpec(
            num_scalar_prefetch=0,
            grid=grid,
            in_specs=[
                pl.BlockSpec((None, K, tm_eff), lambda n, j: (n, 0, j)),
                pl.BlockSpec((OC, K), lambda n, j: (0, 0)),
                pl.BlockSpec((OC, 1), lambda n, j: (0, 0)),
            ],
            out_specs=pl.BlockSpec((None, OC, tm_eff), lambda n, j: (n, 0, j)),
        ),
        compiler_params=pltpu.CompilerParams(
            dimension_semantics=("parallel", "parallel"),
        ),
    )(pt, w_mat, b_mat)

    out = out_flat[:, :, :M] if Mp != M else out_flat
    # (N, OC, M) -> (N, OC, Do, Ho, Wo): pure reshape, no output transpose.
    return out.reshape(N, OC, Do, Ho, Wo)


def reference_conv3d_tanh(x, weight, bias):
    y = lax.conv_general_dilated(
        x, weight,
        window_strides=(2, 2, 2),
        padding="VALID",
        dimension_numbers=("NCDHW", "OIDHW", "NCDHW"),
    )
    return jnp.tanh(y + bias.reshape(1, -1, 1, 1, 1))


if __name__ == "__main__":
    key = jax.random.PRNGKey(0)
    k_x, k_w, k_b = jax.random.split(key, 3)

    # Small shapes consistent with the module: batch=2, in_ch=4, out_ch=8, spatial=16
    N, C, D, H, W = 2, 4, 16, 16, 16
    OC = 8

    x = jax.random.normal(k_x, (N, C, D, H, W), dtype=jnp.float32)

    # Deterministic PyTorch-style init: U(-1/sqrt(fan_in), 1/sqrt(fan_in)), fan_in = C*2*2*2
    fan_in = C * 2 * 2 * 2
    bound = 1.0 / (fan_in ** 0.5)
    weight = jax.random.uniform(k_w, (OC, C, 2, 2, 2), dtype=jnp.float32,
                                minval=-bound, maxval=bound)
    bias = jax.random.uniform(k_b, (OC,), dtype=jnp.float32,
                              minval=-bound, maxval=bound)

    out = jax.block_until_ready(conv3d_tanh(x, weight, bias))
    ref = jax.block_until_ready(reference_conv3d_tanh(x, weight, bias))

    assert out.shape == (N, OC, D // 2, H // 2, W // 2), out.shape
    err = float(jnp.max(jnp.abs(out - ref)))
    assert jnp.allclose(out, ref, atol=1e-5, rtol=1e-4), err

    print("KERNEL_OK")
</pallas_src>

<mosaic_0001>
module attributes {stable_mosaic.version = 11 : i64} {
  func.func @_conv3d_tanh_kernel(%arg0: i32, %arg1: i32, %arg2: memref<1x32x512xf32, #tpu.memory_space<vmem>>, %arg3: memref<8x32xf32, #tpu.memory_space<vmem>>, %arg4: memref<8x1xf32, #tpu.memory_space<vmem>>, %arg5: memref<1x8x512xf32, #tpu.memory_space<vmem>>) attributes {dimension_semantics = [#tpu.dimension_semantics<parallel>, #tpu.dimension_semantics<parallel>], iteration_bounds = array<i64: 2, 1>, scalar_prefetch = 0 : i64, scratch_operands = 0 : i64, tpu.core_type = #tpu.core_type<tc>, window_params = [{transform_indices = @transform_0, window_bounds = array<i64: 1, 32, 512>}, {pipeline_mode = #tpu.pipeline_mode<synchronous>, transform_indices = @transform_1, window_bounds = array<i64: 8, 32>}, {pipeline_mode = #tpu.pipeline_mode<synchronous>, transform_indices = @transform_2, window_bounds = array<i64: 8, 1>}, {transform_indices = @transform_3, window_bounds = array<i64: 1, 8, 512>}]} {
    %c0 = arith.constant 0 : index
    %c0_0 = arith.constant 0 : index
    %0 = vector.load %arg3[%c0, %c0_0] : memref<8x32xf32, #tpu.memory_space<vmem>>, vector<8x32xf32>
    %c0_1 = arith.constant 0 : index
    %c0_2 = arith.constant 0 : index
    %c0_3 = arith.constant 0 : index
    %1 = vector.load %arg2[%c0_1, %c0_2, %c0_3] : memref<1x32x512xf32, #tpu.memory_space<vmem>>, vector<1x32x512xf32>
    %2 = vector.shape_cast %1 : vector<1x32x512xf32> to vector<32x512xf32>
    %cst = arith.constant dense<0.000000e+00> : vector<8x512xf32>
    %3 = tpu.matmul %0, %2, %cst {dimension_numbers = #tpu.dot_dimension_numbers<[1], [0], [0], [1], [0, 0, 1, 1], [], []>} : vector<8x32xf32>, vector<32x512xf32>, vector<8x512xf32> -> vector<8x512xf32>
    %c0_4 = arith.constant 0 : index
    %c0_5 = arith.constant 0 : index
    %4 = vector.load %arg4[%c0_4, %c0_5] : memref<8x1xf32, #tpu.memory_space<vmem>>, vector<8x1xf32>
    %5 = vector.broadcast %4 : vector<8x1xf32> to vector<8x512xf32>
    %6 = arith.addf %3, %5 : vector<8x512xf32>
    %7 = math.tanh %6 : vector<8x512xf32>
    %c0_6 = arith.constant 0 : index
    %c0_7 = arith.constant 0 : index
    %c0_8 = arith.constant 0 : index
    %8 = vector.load %arg5[%c0_6, %c0_7, %c0_8] : memref<1x8x512xf32, #tpu.memory_space<vmem>>, vector<1x8x512xf32>
    %9 = vector.shape_cast %8 : vector<1x8x512xf32> to vector<8x512xf32>
    %10 = vector.shape_cast %7 : vector<8x512xf32> to vector<1x8x512xf32>
    tpu.vector_store %arg5[%c0_6, %c0_7, %c0_8], %10 {strides = array<i32>} : memref<1x8x512xf32, #tpu.memory_space<vmem>>, vector<1x8x512xf32>,
    return
  }
  func.func @transform_0(%arg0: i32, %arg1: i32) -> (i32, i32, i32) {
    %c0_i32 = arith.constant 0 : i32
    %c0_i32_0 = arith.constant 0 : i32
    return %arg0, %c0_i32, %arg1 : i32, i32, i32
  }
  func.func @transform_1(%arg0: i32, %arg1: i32) -> (i32, i32) {
    %c0_i32 = arith.constant 0 : i32
    %c0_i32_0 = arith.constant 0 : i32
    %c0_i32_1 = arith.constant 0 : i32
    return %c0_i32, %c0_i32_0 : i32, i32
  }
  func.func @transform_2(%arg0: i32, %arg1: i32) -> (i32, i32) {
    %c0_i32 = arith.constant 0 : i32
    %c0_i32_0 = arith.constant 0 : i32
    %c0_i32_1 = arith.constant 0 : i32
    return %c0_i32, %c0_i32_0 : i32, i32
  }
  func.func @transform_3(%arg0: i32, %arg1: i32) -> (i32, i32, i32) {
    %c0_i32 = arith.constant 0 : i32
    %c0_i32_0 = arith.constant 0 : i32
    return %arg0, %c0_i32, %arg1 : i32, i32, i32
  }
}

</mosaic_0001>

<bundles_post_ra>
// kernel: tpu_custom_call.1
= control target key start
LH: loop header
LB: loop body
LE: loop exit
PB: predicated region body
PF: predicated region fallthrough
CT: control target
= control target key end

     0   :  { %8 = vsyncpa [#allocation3], 0  ;;  %s886_s0 = inlined_call_operand.hbm [shape: f32[2,32,512], index: 0, kind: input, shape index: {}]   ;;  %s887_s1 = inlined_call_operand.vmem [shape: f32[8,32], index: 1, kind: input, shape index: {}]   ;;  %s888_s2 = inlined_call_operand.vmem [shape: f32[8,1], index: 2, kind: input, shape index: {}]   ;;  %s889_s3 = inlined_call_operand.hbm [shape: f32[2,8,512], index: 3, kind: output, shape index: {}]  }
   0x1   :  { %10 = vsyncpa [#allocation3 + $0x1], 0 }
   0x2   :  { %11 = vsyncpa [#allocation4], 0 }
   0x3   :  { %13 = vsyncpa [#allocation4 + $0x1], 0  ;;  %s717_s12 = smov 0   ;;  %s719_s13 = smov 0  }
   0x4   :  { %s721_s14 = smov 0   ;;  %s723_s15 = smov 0  }
   0x5   :  { %s725_s16 = smov 0   ;;  %s727_s17 = smov 0  }
   0x6 LB: > { %s487_s18 = sadd.s32 4294967295, %s689_s17   ;;  %s488_s19 = sadd.s32 4294967294, %s689_s17   ;;  %s689_s17 = sphi %s727_s17, %s19_s17   ;;  %s685_s16 = sphi %s725_s16, %s900_s16   ;;  %s681_s15 = sphi %s723_s15, %s899_s15   ;;  %s677_s14 = sphi %s721_s14, %s898_s14   ;;  %s673_s13 = sphi %s719_s13, %s897_s13   ;;  %s669_s12 = sphi %s717_s12, %s896_s12  }
   0x7   : > { %s31_s20 = sadd.s32 1, %s685_s16  ;;  %s40_s21 = sadd.s32 1, %s677_s14 }
   0x8   : > { %p33_p0 = scmp.ge.s32.totalorder %s31_s20, 2  ;;  %p47_p1 = scmp.ne.s32.totalorder %s677_s14, %s673_s13 }
   0x9   : > { %p48_p2 = scmp.eq.s32.totalorder %s689_s17, 0  ;;  %p53_p3 = scmp.ne.s32.totalorder %s673_s13, %s669_s12 }
   0xa   : > { %s902_s20 = smov (%p33_p0, %s31_s20), 0  ;;  %p54_p5 = scmp.eq.s32.totalorder %s487_s18, 0 }
   0xb   : > { %p758_p4 = por %p48_p2, %p47_p1  ;;  %s35_s23 = ssub.s32 %s685_s16, %s902_s20 }
   0xc   : > { %p121_p6 = scmp.eq.s32.totalorder %s487_s18, 1  ;;  %p38_p7 = scmp.eq.s32.totalorder %s35_s23, 0 }
   0xd   : > { %p764_p8 = por %p54_p5, %p53_p3  ;;  %p127_p10 = scmp.eq.s32.totalorder %s488_s19, 1 }
   0xe   : > { %p768_p9 = por %p121_p6, %p47_p1  ;;  %p518_p13 = scmp.lt.s32.totalorder %s689_s17, 2 }
   0xf   : > { %s773_s26 = scalar_select %p38_p7, %s677_s14, %s40_s21  }
  0x10   : > { %p775_p11 = por %p127_p10, %p53_p3  ;;  %s153_s28 = sand.u32 1, %s677_s14  }
  0x11   : > { %s491_s29 = sshll.u32 %s153_s28, 7  ;;  %s504_s30 = sshll.u32 %s685_s16, 11 }
  0x12   : > { %s165_s6 = scalar_lea.hbm %s886_s0, %s504_s30  ;;  %s157_s7 = scalar_lea.vmem [#allocation2], %s491_s29 }
  0x13   : > { %s166_s8 = sshll.u32 %s157_s7, 4  ;;  %p788_p0 = pnand %p518_p13, %p758_p4  ;;  %s167_s8 = int_to_ptr.vmem [resolvable:$true] %s166_s8 }
  0x14   : > { %p494_p1 = scmp.ge.s32.totalorder %s689_s17, 1  ;;  %s154_s10 = scalar_lea.sflag [#allocation3], %s153_s28 }
  0x15   : > { %p583_p2 = pneg %p788_p0  ;;  %s594_s11 = scalar_lea.vmem %s167_s8, 2048 }
  0x16   : > { %p595_p3 = scmp.ne.s32.totalorder %s167_s8, %s594_s11  ;;  %s691_s18 = smov [#allocation2]  }
  0x17   : > { %s599_s19 = sshll.u32 %s691_s18, 4  ;;  %s600_s19 = int_to_ptr.vmem [resolvable:$false] %s599_s19 }
  0x18   : > { %p597_p5 = pnand %p595_p3, %p583_p2  ;;  %s601_s21 = scalar_lea.vmem %s600_s19, 4096 }
  0x19   : > { %p602_p7 = scmp.lt.s32.totalorder %s167_s8, %s600_s19  ;;  %p603_p10 = scmp.lt.s32.totalorder %s601_s21, %s594_s11 }
  0x1a   : > { %p598_p6 = pneg %p597_p5 }
  0x1b   : > { %p604_p12 = por %p603_p10, %p602_p7 }
  0x1d   : > { %p605_p4 = pnand %p604_p12, %p598_p6 }
  0x1f   : > { %608 = shalt.err (!%p605_p4)
}
  0x20   : > { %s692_s22 = smov 512   ;;  %s693_s23 = smov 32  }
  0x21   : > { %513 = dma.hbm_to_vmem [thread:$0]  (!%p788_p0), %s165_s6, 2048, %s167_s8, %s154_s10, %s692_s22, %s692_s22, %s693_s23  }
  0x22   : > { %p174_p13 = scmp.lt.s32.totalorder %s689_s17, 3 }
  0x24   : > { %p175_p2 = pnand %p494_p1, %p174_p13 }
  0x25   : > { %s801_s28 = sand.u32 (!%p175_p2), 1, %s673_s13  }
  0x26   : > { %178 = sbr.rel (%p175_p2) target bundleno = 279 (0x117), region = 32  ;;  %s495_s29 = sshll.u32 (!%p175_p2), %s801_s28, 7 }
  0x27   : > { %s181_s30 = scalar_lea.sflag (!%p175_p2), [#allocation3], %s801_s28  ;;  %s805_s4 = scalar_lea.vmem (!%p175_p2), [#allocation2], %s495_s29 }
  0x2b   : > { %660 = dma.done.wait (%p764_p8), %s181_s30, 2048  }
  0x2c   : > { %662 = vsyncadd (%p764_p8), %s181_s30, 4294965248  ;;  %v694_v0 = vmov 0.0   ;;  %v695_v1 = vmov 0   ;;  %v223_v2 = vld [vmem:[%s805_s4 + $0x68] sm:$0xff]  ;;  %v225_v3 = vld [vmem:[%s805_s4 + $0x78] sm:$0xff]  ;;  %vm232_vm0 = vcmask 261120  }
  0x2d   : > { %300 = vmatprep.mubr.f32.mxu0 %v694_v0  ;;  %371 = vmatprep.mubr.f32.mxu1 %v694_v0  ;;  %v222_v4 = vld [vmem:[%s805_s4 + $0x60] sm:$0xff]  ;;  %v224_v5 = vld [vmem:[%s805_s4 + $0x70] sm:$0xff]  ;;  %v219_v6 = vld [vmem:[%s805_s4 + $0x48] sm:$0xff]  ;;  %s496_s8 = sshll.u32 %s801_s28, 5  ;;  %s505_s9 = sshll.u32 %s681_s15, 9 }
  0x2e   : > { %572 = vset.pattern.permute.xlu0 %v695_v1  ;;  %260 = vmatprep.subr.mxu0 %v223_v2  ;;  %v221_v7 = vld [vmem:[%s805_s4 + $0x58] sm:$0xff]  ;;  %v218_v8 = vld [vmem:[%s805_s4 + $0x40] sm:$0xff]  ;;  %v220_v9 = vld [vmem:[%s805_s4 + $0x50] sm:$0xff]  ;;  %s206_s10 = scalar_lea.vmem [#allocation5], %s496_s8  ;;  %s838_s21 = scalar_lea.hbm %s889_s3, %s505_s9 }
  0x2f   : > { %331 = vmatprep.subr.mxu1 %v225_v3  ;;  %261 = vmatpush1.msra.mxu0 %v222_v4  ;;  %v215_v10 = vld [vmem:[%s805_s4 + $0x28] sm:$0xff]  ;;  %v217_v11 = vld [vmem:[%s805_s4 + $0x38] sm:$0xff]  ;;  %v214_v12 = vld [vmem:[%s805_s4 + $0x20] sm:$0xff]  ;;  %s403_s11 = sshll.u32 %s206_s10, 4  ;;  %s387_s15 = scalar_lea.sflag [#allocation4], %s801_s28  ;;  %s840_s11 = int_to_ptr.vmem [resolvable:$true] %s403_s11 }
  0x30   : > { %332 = vmatpush1.msra.mxu1 %v224_v5  ;;  %262 = vmatprep.subr.mxu0 %v219_v6  ;;  %v216_v13 = vld [vmem:[%s805_s4 + $0x30] sm:$0xff]  ;;  %v211_v14 = vld [vmem:[%s805_s4 + $0x8] sm:$0xff]  ;;  %v213_v15 = vld [vmem:[%s805_s4 + $0x18] sm:$0xff]  ;;  %s609_s22 = scalar_lea.vmem %s840_s11, 512  ;;  %s696_s23 = smov [#allocation5]  }
  0x31   : > { %333 = vmatprep.subr.mxu1 %v221_v7  ;;  %263 = vmatpush1.msra.mxu0 %v218_v8  ;;  %v210_v16 = vld [vmem:[%s805_s4] sm:$0xff]  ;;  %v212_v17 = vld [vmem:[%s805_s4 + $0x10] sm:$0xff]  ;;  %p610_p8 = scmp.ne.s32.totalorder %s840_s11, %s609_s22  ;;  %s613_s29 = sshll.u32 %s696_s23, 4  ;;  %s614_s29 = int_to_ptr.vmem [resolvable:$false] %s613_s29 }
  0x32   : > { %334 = vmatpush1.msra.mxu1 %v220_v9  ;;  %264 = vmatprep.subr.mxu0 %v215_v10  ;;  %v209_v18 = vld [vmem:[%s887_s1] sm:$0xff]  ;;  %s615_s30 = scalar_lea.vmem %s614_s29, 1024  ;;  %p616_p1 = scmp.lt.s32.totalorder %s840_s11, %s614_s29 }
  0x33   : > { %335 = vmatprep.subr.mxu1 %v217_v11  ;;  %265 = vmatpush1.msra.mxu0 %v214_v12  ;;  %v226_v19 = vld [vmem:[%s888_s2] sm:$0xff]  ;;  %p611_p12 = pnand %p610_p8, %p768_p9  ;;  %p617_p3 = scmp.lt.s32.totalorder %s615_s30, %s609_s22 }
  0x34   : > { %336 = vmatpush1.msra.mxu1 %v216_v13  ;;  %266 = vmatprep.subr.mxu0 %v211_v14 }
  0x35   : > { %337 = vmatprep.subr.mxu1 %v213_v15  ;;  %267 = vmatpush1.msra.mxu0 %v210_v16  ;;  %p612_p0 = pneg %p611_p12  ;;  %p618_p5 = por %p617_p3, %p616_p1 }
  0x36   : > { %338 = vmatpush1.msra.mxu1 %v212_v17  ;;  %497 = vmatmul.mubr.msk.f32.vlgmr.msra.gmra.mxu0 %vm232_vm0, %v209_v18 }
  0x37   : > { %498 = vmatmul.mubr.msk.f32.vlgmr.msra.gmra.mxu1 %vm232_vm0, %v209_v18  ;;  %229 = vperm.xlu0 %572, %v226_v19   ;;  %p619_p6 = pnand %p618_p5, %p612_p0 }
  0xb2   : > { %v230_v20 = vpop.permute.xlu0 %229 }
  0xf6   : > { %v302_v21 = vpop.f32.mrf.mxu0 }
  0xf7   : > { %v373_v22 = vpop.f32.mrf.mxu1  ;;  %v303_v23 = vadd.f32 %v302_v21, %v230_v20 }
  0xf8   : > { %v374_v24 = vadd.f32 %v373_v22, %v230_v20  ;;  %v304_v25 = vpop.f32.mrf.mxu0 }
  0xf9   : > { %v375_v26 = vpop.f32.mrf.mxu1  ;;  %573 = vtanh.f32 %v303_v23  ;;  %v305_v27 = vadd.f32 %v304_v25, %v230_v20 }
  0xfa   : > { %v376_v28 = vadd.f32 %v375_v26, %v230_v20  ;;  %575 = vtanh.f32 %v374_v24 }
  0xfb   : > { %577 = vtanh.f32 %v305_v27 }
  0xfc   : > { %579 = vtanh.f32 %v376_v28 }
 0x106   : > { %v574_v29 = vpop.eup %573 }
 0x107   : > { %v576_v30 = vpop.eup %575  ;;  %382 = vst [vmem:[%s206_s10] sm:$0xff] %v574_v29 }
 0x108   : > { %v578_v31 = vpop.eup %577  ;;  %384 = vst [vmem:[%s206_s10 + $0x10] sm:$0xff] %v576_v30 }
 0x109   : > { %v580_v32 = vpop.eup %579  ;;  %383 = vst [vmem:[%s206_s10 + $0x8] sm:$0xff] %v578_v31 }
 0x10a   : > { %385 = vst [vmem:[%s206_s10 + $0x18] sm:$0xff] %v580_v32 }
 0x10b   : > { %622 = shalt.err (!%p619_p6)
}
 0x10c   : > { %s623_s4 = scalar_lea.hbm %s838_s21, 512  ;;  %s627_s5 = scalar_lea.hbm %s889_s3, 1024 }
 0x10d   : > { %p624_p7 = scmp.ne.s32.totalorder %s838_s21, %s623_s4  ;;  %p628_p13 = scmp.lt.s32.totalorder %s838_s21, %s889_s3 }
 0x10e   : > { %p629_p2 = scmp.lt.s32.totalorder %s627_s5, %s623_s4 }
 0x10f   : > { %p625_p10 = pnand %p624_p7, %p768_p9 }
 0x110   : > { %p630_p8 = por %p629_p2, %p628_p13 }
 0x111   : > { %p626_p4 = pneg %p625_p10 }
 0x113   : > { %p631_p12 = pnand %p630_p8, %p626_p4 }
 0x115   : > { %634 = shalt.err (!%p631_p12)
}
 0x116   : > { %508 = dma.vmem_to_hbm [thread:$0]  (%p768_p9), %s840_s11, 512, %s838_s21, %s387_s15  }
 0x117 PF: > { %s415_s8 = sand.u32 1, %s669_s12   ;;  %p895_p0 = scmp.ge.s32.totalorder %s689_s17, 2 }
 0x118   : > { %s416_s9 = scalar_lea.sflag [#allocation4], %s415_s8 }
 0x119   : > { %p515_p1 = pnand %p895_p0, %p775_p11 }
 0x11b   : > { %p516_p3 = pneg %p515_p1 }
 0x11d   : > { %664 = dma.done.wait (%p516_p3), %s416_s9, 512  }
 0x11e   : > { %666 = vsyncadd (%p516_p3), %s416_s9, 4294966784  ;;  %s19_s17 = sadd.s32 1, %s689_s17   ;;  %s896_s12 = smov %s673_s13 }
 0x11f   : > { %p16_p5 = scmp.ge.s32.totalorder %s19_s17, 4   ;;  %s897_s13 = smov %s677_s14 }
 0x120   : > { %s898_s14 = smov %s773_s26  ;;  %s899_s15 = smov %s685_s16 }
 0x121   : > { %s900_s16 = smov %s902_s20  ;;  %18 = sbr.rel (!%p16_p5) target bundleno = 6 (0x6), region = 77 }
 0x126   :  { %421 = vsyncpa [#allocation3], 1 }
 0x127   :  { %423 = vsyncpa [#allocation3 + $0x1], 1 }
 0x128   :  { %424 = vsyncpa [#allocation4], 1 }
 0x129   :  { %426 = vsyncpa [#allocation4 + $0x1], 1 }

</bundles_post_ra>
